<compile_context>
chip_gen: v5e
topology: v5e:2x2
jax: 0.10.0
libtpu: 0.0.40
codegen_flags: <defaults>
</compile_context>

<pallas_src>
import jax
import jax.numpy as jnp
from jax.experimental import pallas as pl
from jax.experimental.pallas import tpu as pltpu


_VMEM_LIMIT_BYTES = 56 << 20  # safe on v7x (64 MiB / TC); well under v5e/v6e 128 MiB
_VMEM_PLAN_BYTES = 46 << 20   # planning budget for kernel-managed buffers


def _round_up(x: int, m: int) -> int:
    return (x + m - 1) // m * m


# ----------------------------------------------------------------------------
# Kernels
# ----------------------------------------------------------------------------
def _lorae_resident_kernel(x_ref, w_ref, o_ref):
    # x_ref: (tm, dp) tile of x; w_ref: (dp, dp) VMEM-resident W.T;
    # o_ref: (tm, dp) output tile.  Full contraction per grid step.
    o_ref[...] = jnp.dot(
        x_ref[...], w_ref[...], preferred_element_type=jnp.float32
    ).astype(o_ref.dtype)


def _lorae_tiled_kernel_f32out(x_ref, w_ref, o_ref):
    # Output block is resident across the K axis -> accumulate directly into it
    # (f32 output only), no scratch accumulator needed.
    @pl.when(pl.program_id(2) == 0)
    def _():
        o_ref[...] = jnp.zeros_like(o_ref)

    o_ref[...] += jnp.dot(
        x_ref[...], w_ref[...], preferred_element_type=jnp.float32)


def _lorae_tiled_kernel_acc(x_ref, w_ref, o_ref, acc_ref):
    # Non-f32 output: accumulate in an f32 VMEM scratch, cast once at the end.
    @pl.when(pl.program_id(2) == 0)
    def _():
        acc_ref[...] = jnp.zeros_like(acc_ref)

    acc_ref[...] += jnp.dot(
        x_ref[...], w_ref[...], preferred_element_type=jnp.float32)

    @pl.when(pl.program_id(2) == pl.num_programs(2) - 1)
    def _():
        o_ref[...] = acc_ref[...].astype(o_ref.dtype)


# ----------------------------------------------------------------------------
# Wrapper
# ----------------------------------------------------------------------------
def _choose_tm(m: int, max_tm: int) -> int:
    """Pick the M tile: minimize padding waste, keep >= 2 parallel steps."""
    max_tm = max(8, min(int(max_tm), 512))
    if m <= max_tm:
        tm = _round_up(m, 8)
    else:
        tm, best_waste = 8, None
        for t in (512, 256, 128, 64):
            if t > max_tm:
                continue
            waste = _round_up(m, t) - m
            if best_waste is None or waste < best_waste:
                tm, best_waste = t, waste
    # v7x has 2 TensorCores: make sure the 'parallel' M axis has >= 2 steps.
    if _round_up(m, tm) // tm < 2 and m > 8:
        tm = _round_up(pl.cdiv(m, 2), 8)
    return tm


def lorae_forward(x: jax.Array, weight: jax.Array, *,
                  use_bf16_matmul: bool = False,
                  _force_tiled: bool = False) -> jax.Array:
    """Apply y = x @ weight.T over the last dim of x (nn.Linear, bias=False)."""
    *lead, d = x.shape
    assert weight.shape == (d, d)
    m = 1
    for s in lead:
        m *= s

    out_dtype = x.dtype
    compute_dtype = jnp.bfloat16 if use_bf16_matmul else x.dtype
    esize = jnp.dtype(compute_dtype).itemsize
    out_esize = jnp.dtype(out_dtype).itemsize

    # Lane-dense feature padding (multiple of 128).  Zero-padding the
    # contraction dim is exact; padded output rows/cols are sliced off.
    dp = _round_up(max(d, 128), 128)

    # Cast in the wrapper (halves HBM/VMEM traffic for the bf16 path) and
    # transpose W once here: kernel runs a plain (M,K)x(K,N) contraction.
    x2d = x.reshape(m, d).astype(compute_dtype)
    wt = weight.T.astype(compute_dtype)
    if dp != d:
        wt = jnp.pad(wt, ((0, dp - d), (0, dp - d)))

    # --- residency decision -------------------------------------------------
    w_bytes = dp * dp * esize                 # W.T resident, single buffer
    per_row = 2 * dp * (esize + out_esize)    # double-buffered x + out rows
    max_tm_resident = 0
    if w_bytes < _VMEM_PLAN_BYTES:
        max_tm_resident = (_VMEM_PLAN_BYTES - w_bytes) // per_row
    resident = (not _force_tiled) and max_tm_resident >= 64

    if resident:
        # -------- resident-weight path: one HBM pass per operand ------------
        tm = _choose_tm(m, max_tm_resident)
        mp = _round_up(m, tm)
        xp = x2d
        if (mp, dp) != (m, d):
            xp = jnp.pad(x2d, ((0, mp - m), (0, dp - d)))

        cost = pl.CostEstimate(
            flops=2 * mp * dp * dp,
            transcendentals=0,
            bytes_accessed=mp * dp * esize + dp * dp * esize
                           + mp * dp * out_esize,
        )
        out = pl.pallas_call(
            _lorae_resident_kernel,
            out_shape=jax.ShapeDtypeStruct((mp, dp), out_dtype),
            grid_spec=pltpu.PrefetchScalarGridSpec(
                num_scalar_prefetch=0,
                grid=(mp // tm,),
                in_specs=[
                    pl.BlockSpec((tm, dp), lambda i: (i, 0)),            # x tile
                    pl.BlockSpec((dp, dp), lambda i: (0, 0),             # W.T resident
                                 pipeline_mode=pl.Buffered(1)),
                ],
                out_specs=pl.BlockSpec((tm, dp), lambda i: (i, 0)),
            ),
            compiler_params=pltpu.CompilerParams(
                dimension_semantics=("parallel",),
                vmem_limit_bytes=_VMEM_LIMIT_BYTES,
            ),
            cost_estimate=cost,
        )(xp, wt)
    else:
        # -------- tiled fallback (weight too large to keep resident) --------
        tn = next(t for t in (512, 256, 128) if dp % t == 0)
        tk = next(t for t in (1024, 512, 256, 128) if dp % t == 0)
        tm = _choose_tm(m, 512)
        mp = _round_up(m, tm)
        xp = x2d
        if (mp, dp) != (m, d):
            xp = jnp.pad(x2d, ((0, mp - m), (0, dp - d)))

        f32_out = out_dtype == jnp.float32
        kernel = _lorae_tiled_kernel_f32out if f32_out else _lorae_tiled_kernel_acc
        scratch = [] if f32_out else [pltpu.VMEM((tm, tn), jnp.float32)]

        cost = pl.CostEstimate(
            flops=2 * mp * dp * dp,
            transcendentals=0,
            # x is re-read (dp/tn) times, W.T is re-read (mp/tm) times.
            bytes_accessed=(dp // tn) * mp * dp * esize
                           + (mp // tm) * dp * dp * esize
                           + mp * dp * out_esize,
        )
        out = pl.pallas_call(
            kernel,
            out_shape=jax.ShapeDtypeStruct((mp, dp), out_dtype),
            grid_spec=pltpu.PrefetchScalarGridSpec(
                num_scalar_prefetch=0,
                grid=(mp // tm, dp // tn, dp // tk),
                in_specs=[
                    pl.BlockSpec((tm, tk), lambda i, j, k: (i, k)),  # x tile
                    pl.BlockSpec((tk, tn), lambda i, j, k: (k, j)),  # W.T tile
                ],
                out_specs=pl.BlockSpec((tm, tn), lambda i, j, k: (i, j)),
                scratch_shapes=scratch,
            ),
            compiler_params=pltpu.CompilerParams(
                dimension_semantics=("parallel", "parallel", "arbitrary"),
                vmem_limit_bytes=_VMEM_LIMIT_BYTES,
            ),
            cost_estimate=cost,
        )(xp, wt)

    if (mp, dp) != (m, d):
        out = out[:m, :d]
    return out.reshape(*lead, d)


# TODO(synk): LoRAE.loss() uses torch.linalg.norm(W, ord='nuc') (SVD-based
# nuclear norm); SVD has no clean Pallas TPU kernel equivalent, so it is not
# implemented here.


if __name__ == "__main__":
    key = jax.random.PRNGKey(0)
    B, S, D = 2, 8, 32  # small shapes; dim = 32

    kx, kw = jax.random.split(key)
    x = jax.random.normal(kx, (B, S, D), dtype=jnp.float32)

    # Module __init__: weight of shape (dim, dim), zero-initialized.
    weight = jnp.zeros((D, D), dtype=jnp.float32)
    y = jax.block_until_ready(lorae_forward(x, weight))
    ref = x @ weight.T
    assert y.shape == (B, S, D)
    assert jnp.allclose(y, ref, atol=1e-5), "mismatch with zero-init weight"

    # Nonzero weight: checks the math on the resident-weight fast path.
    w2 = jax.random.normal(kw, (D, D), dtype=jnp.float32) * 0.02
    y2 = jax.block_until_ready(lorae_forward(x, w2))
    ref2 = x @ w2.T
    assert jnp.allclose(y2, ref2, atol=1e-4), "resident path mismatch"

    # Tiled fallback path (used only for very large dim) — exercised here
    # at small shapes for compile/run coverage.
    y3 = jax.block_until_ready(lorae_forward(x, w2, _force_tiled=True))
    assert jnp.allclose(y3, ref2, atol=1e-4), "tiled path mismatch"

    # bf16-in-HBM fast path (f32 MXU accumulation): looser tolerance.
    y4 = jax.block_until_ready(lorae_forward(x, w2, use_bf16_matmul=True))
    assert jnp.allclose(y4, ref2, atol=2e-2, rtol=2e-2), "bf16 path mismatch"

    print("KERNEL_OK")
</pallas_src>

<mosaic_0001>
module attributes {stable_mosaic.version = 11 : i64} {
  func.func @_lorae_resident_kernel(%arg0: i32, %arg1: memref<8x128xf32, #tpu.memory_space<vmem>>, %arg2: memref<128x128xf32, #tpu.memory_space<vmem>>, %arg3: memref<8x128xf32, #tpu.memory_space<vmem>>) attributes {dimension_semantics = [#tpu.dimension_semantics<parallel>], iteration_bounds = array<i64: 2>, scalar_prefetch = 0 : i64, scratch_operands = 0 : i64, tpu.core_type = #tpu.core_type<tc>, window_params = [{transform_indices = @transform_0, window_bounds = array<i64: 8, 128>}, {pipeline_mode = #tpu.pipeline_mode<synchronous>, transform_indices = @transform_1, window_bounds = array<i64: 128, 128>}, {transform_indices = @transform_2, window_bounds = array<i64: 8, 128>}]} {
    %c0 = arith.constant 0 : index
    %c0_0 = arith.constant 0 : index
    %0 = vector.load %arg1[%c0, %c0_0] : memref<8x128xf32, #tpu.memory_space<vmem>>, vector<8x128xf32>
    %c0_1 = arith.constant 0 : index
    %c0_2 = arith.constant 0 : index
    %1 = vector.load %arg2[%c0_1, %c0_2] : memref<128x128xf32, #tpu.memory_space<vmem>>, vector<128x128xf32>
    %cst = arith.constant dense<0.000000e+00> : vector<8x128xf32>
    %2 = tpu.matmul %0, %1, %cst {dimension_numbers = #tpu.dot_dimension_numbers<[1], [0], [0], [1], [0, 0, 1, 1], [], []>} : vector<8x128xf32>, vector<128x128xf32>, vector<8x128xf32> -> vector<8x128xf32>
    %c0_3 = arith.constant 0 : index
    %c0_4 = arith.constant 0 : index
    %3 = vector.load %arg3[%c0_3, %c0_4] : memref<8x128xf32, #tpu.memory_space<vmem>>, vector<8x128xf32>
    tpu.vector_store %arg3[%c0_3, %c0_4], %2 {strides = array<i32>} : memref<8x128xf32, #tpu.memory_space<vmem>>, vector<8x128xf32>,
    return
  }
  func.func @transform_0(%arg0: i32) -> (i32, i32) {
    %c0_i32 = arith.constant 0 : i32
    %c0_i32_0 = arith.constant 0 : i32
    return %arg0, %c0_i32 : i32, i32
  }
  func.func @transform_1(%arg0: i32) -> (i32, i32) {
    %c0_i32 = arith.constant 0 : i32
    %c0_i32_0 = arith.constant 0 : i32
    %c0_i32_1 = arith.constant 0 : i32
    return %c0_i32, %c0_i32_0 : i32, i32
  }
  func.func @transform_2(%arg0: i32) -> (i32, i32) {
    %c0_i32 = arith.constant 0 : i32
    %c0_i32_0 = arith.constant 0 : i32
    return %arg0, %c0_i32 : i32, i32
  }
}

</mosaic_0001>

<bundles_post_ra>
// kernel: tpu_custom_call.1
= control target key start
LH: loop header
LB: loop body
LE: loop exit
PB: predicated region body
PF: predicated region fallthrough
CT: control target
= control target key end

     0   :  { %7 = vsyncpa [#allocation3], 0  ;;  %s678_s0 = inlined_call_operand.hbm [shape: f32[16,128], index: 0, kind: input, shape index: {}]   ;;  %s679_s1 = inlined_call_operand.hbm [shape: f32[128,128], index: 1, kind: input, shape index: {}]   ;;  %s680_s2 = inlined_call_operand.hbm [shape: f32[16,128], index: 2, kind: output, shape index: {}]  }
   0x1   :  { %9 = vsyncpa [#allocation3 + $0x1], 0 }
   0x2   :  { %10 = vsyncpa [#allocation6], 0 }
   0x3   :  { %11 = vsyncpa [#allocation4], 0 }
   0x4   :  { %13 = vsyncpa [#allocation4 + $0x1], 0  ;;  %s535_s9 = smov 0   ;;  %s537_s10 = smov 0  }
   0x5   :  { %s539_s11 = smov 0   ;;  %s541_s12 = smov 0  }
   0x6 LB: > { %s108_s15 = sshll.u32 %s679_s1, 4  ;;  %s559_s16 = sadd.s32 4294967295, %s515_s12   ;;  %s515_s12 = sphi %s541_s12, %s690_s12   ;;  %s511_s11 = sphi %s539_s11, %s689_s11   ;;  %s507_s10 = sphi %s537_s10, %s688_s10   ;;  %s503_s9 = sphi %s535_s9, %s687_s9   ;;  %s109_s15 = int_to_ptr.hbm [resolvable:$true] %s108_s15 }
   0x7   : > { %p313_p0 = scmp.ge.s32.totalorder %s515_s12, 1  ;;  %p40_p1 = scmp.eq.s32.totalorder %s559_s16, 0 }
   0x8   : > { %p97_p2 = scmp.lt.s32.totalorder %s515_s12, 3  ;;  %s517_s18 = smov [#allocation5]  }
   0x9   : > { %s110_s19 = sshll.u32 %s517_s18, 4  ;;  %s518_s20 = smov 128   ;;  %s111_s19 = int_to_ptr.vmem [resolvable:$true] %s110_s19 }
   0xa   : > { %p564_p3 = pnand %p313_p0, %p97_p2  ;;  %s519_s21 = smov 8  }
   0xb   : > { %s312_s22 = sadd.s32 4294967294, %s515_s12   ;;  %s575_s23 = sadd.s32 1, %s515_s12  }
   0xc   : > { %p334_p4 = pneg %p564_p3  ;;  %s26_s24 = sadd.s32 1, %s511_s11 }
   0xd   : > { %s23_s25 = ssub.s32 %s515_s12, %s575_s23  ;;  %p33_p7 = scmp.ne.s32.totalorder %s511_s11, %s507_s10 }
   0xe   : > { %p335_p6 = pnand %p334_p4, %p40_p1  ;;  %p24_p8 = scmp.eq.s32.totalorder %s23_s25, 0 }
   0xf   : > { %p34_p9 = scmp.eq.s32.totalorder %s515_s12, 0  ;;  %p39_p10 = scmp.ne.s32.totalorder %s507_s10, %s503_s9 }
  0x10   : > { %337 = dma.hbm_to_vmem [thread:$0]  (!%p335_p6), %s109_s15, 2048, %s111_s19, [#allocation6], %s518_s20, %s518_s20, %s519_s21  }
  0x11   : > { %p84_p11 = scmp.eq.s32.totalorder %s559_s16, 1  ;;  %p591_p12 = por %p40_p1, %p39_p10 }
  0x12   : > { %s587_s26 = scalar_select %p24_p8, %s511_s11, %s26_s24  }
  0x13   : > { %p595_p13 = por %p84_p11, %p33_p7  ;;  %p90_p0 = scmp.eq.s32.totalorder %s312_s22, 1 }
  0x14   : > { %p35_p2 = por %p34_p9, %p33_p7  ;;  %s124_s29 = sand.u32 1, %s511_s11  }
  0x15   : > { %p600_p4 = por %p90_p0, %p39_p10  ;;  %p347_p6 = scmp.lt.s32.totalorder %s515_s12, 2 }
  0x16   : > { %s316_s3 = sshll.u32 %s124_s29, 3  ;;  %s317_s4 = sshll.u32 %s515_s12, 3 }
  0x17   : > { %s132_s7 = scalar_lea.hbm %s678_s0, %s317_s4  ;;  %s128_s13 = scalar_lea.vmem [#allocation2], %s316_s3 }
  0x18   : > { %s134_s8 = sshll.u32 %s132_s7, 4  ;;  %s136_s14 = sshll.u32 %s128_s13, 4  ;;  %s135_s8 = int_to_ptr.hbm [resolvable:$true] %s134_s8  ;;  %s137_s14 = int_to_ptr.vmem [resolvable:$true] %s136_s14 }
  0x19   : > { %p609_p8 = pnand %p347_p6, %p35_p2  ;;  %s125_s18 = scalar_lea.sflag [#allocation3], %s124_s29 }
  0x1a   : > { %s415_s19 = sshra.s32 %s135_s8, 4  ;;  %s422_s24 = scalar_lea.hbm %s678_s0, 16  ;;  %s416_s19 = int_to_ptr.hbm [resolvable:$true] %s415_s19 }
  0x1b   : > { %s417_s20 = scalar_lea.hbm %s416_s19, 8  ;;  %p419_p9 = pneg %p609_p8 }
  0x1c   : > { %p418_p7 = scmp.ne.s32.totalorder %s416_s19, %s417_s20  ;;  %p423_p0 = scmp.lt.s32.totalorder %s416_s19, %s678_s0 }
  0x1d   : > { %p424_p2 = scmp.lt.s32.totalorder %s422_s24, %s417_s20 }
  0x1e   : > { %p420_p10 = pnand %p419_p9, %p418_p7 }
  0x1f   : > { %p425_p6 = por %p424_p2, %p423_p0 }
  0x20   : > { %p421_p11 = pneg %p420_p10 }
  0x22   : > { %p426_p5 = pnand %p425_p6, %p421_p11 }
  0x24   : > { %429 = shalt.err (!%p426_p5)
}
  0x25   : > { %341 = dma.hbm_to_vmem [thread:$0]  (!%p609_p8), %s135_s8, 128, %s137_s14, %s125_s18  }
  0x26   : > { %145 = sbr.rel (%p564_p3) target bundleno = 207 (0xcf), region = 28  ;;  %s626_s29 = sand.u32 (!%p564_p3), 1, %s507_s10  }
  0x27   : > { %s319_s4 = sshll.u32 (!%p564_p3), %s626_s29, 3  ;;  %s148_s5 = scalar_lea.sflag (!%p564_p3), [#allocation3], %s626_s29 }
  0x28   : > { %s632_s6 = scalar_lea.vmem (!%p564_p3), [#allocation2], %s319_s4 }
  0x2b   : > { %490 = dma.done.wait (%p591_p12), %s148_s5, 128  }
  0x2c   : > { %492 = vsyncadd (%p591_p12), %s148_s5, 4294967168 }
  0x2d   : > { %494 = dma.done.wait (%p40_p1), [#allocation6], 2048  }
  0x2e   : > { %496 = vsyncadd (%p40_p1), [#allocation6], 4294965248  ;;  %v194_v0 = vld [vmem:[#allocation5 + $0x78] sm:$0xff]  ;;  %v193_v1 = vld [vmem:[#allocation5 + $0x70] sm:$0xff]  ;;  %s323_s17 = sshll.u32 %s559_s16, 3  ;;  %s177_s13 = scalar_lea.vmem [#allocation7], %s319_s4 }
  0x2f   : > { %195 = vmatpush.msra.mxu0 %v194_v0  ;;  %v192_v2 = vld [vmem:[#allocation5 + $0x68] sm:$0xff]  ;;  %v191_v3 = vld [vmem:[#allocation5 + $0x60] sm:$0xff]  ;;  %v190_v4 = vld [vmem:[#allocation5 + $0x58] sm:$0xff]  ;;  %s227_s8 = scalar_lea.hbm %s680_s2, %s323_s17  ;;  %s229_s14 = sshll.u32 %s177_s13, 4  ;;  %s230_s14 = int_to_ptr.vmem [resolvable:$true] %s229_s14 }
  0x30   : > { %v189_v5 = vld [vmem:[#allocation5 + $0x50] sm:$0xff]  ;;  %v188_v6 = vld [vmem:[#allocation5 + $0x48] sm:$0xff]  ;;  %v187_v7 = vld [vmem:[#allocation5 + $0x40] sm:$0xff]  ;;  %s231_s15 = sshll.u32 %s227_s8, 4  ;;  %s217_s18 = scalar_lea.sflag [#allocation4], %s626_s29  ;;  %s232_s15 = int_to_ptr.hbm [resolvable:$true] %s231_s15 }
  0x31   : > { %196 = vmatpush.msra.mxu0 %v193_v1  ;;  %v186_v8 = vld [vmem:[#allocation5 + $0x38] sm:$0xff]  ;;  %v185_v9 = vld [vmem:[#allocation5 + $0x30] sm:$0xff]  ;;  %v184_v10 = vld [vmem:[#allocation5 + $0x28] sm:$0xff]  ;;  %s459_s19 = sshra.s32 %s232_s15, 4  ;;  %s465_s22 = scalar_lea.hbm %s680_s2, 16  ;;  %s460_s19 = int_to_ptr.hbm [resolvable:$true] %s459_s19 }
  0x32   : > { %v183_v11 = vld [vmem:[#allocation5 + $0x20] sm:$0xff]  ;;  %v182_v12 = vld [vmem:[#allocation5 + $0x18] sm:$0xff]  ;;  %v181_v13 = vld [vmem:[#allocation5 + $0x10] sm:$0xff]  ;;  %s461_s20 = scalar_lea.hbm %s460_s19, 8  ;;  %p466_p12 = scmp.lt.s32.totalorder %s460_s19, %s680_s2 }
  0x33   : > { %197 = vmatpush.msra.mxu0 %v192_v2  ;;  %v180_v14 = vld [vmem:[#allocation5 + $0x8] sm:$0xff]  ;;  %v179_v15 = vld [vmem:[#allocation5] sm:$0xff]  ;;  %v178_v16 = vld [vmem:[%s632_s6] sm:$0xff]  ;;  %p462_p1 = scmp.ne.s32.totalorder %s460_s19, %s461_s20  ;;  %p467_p8 = scmp.lt.s32.totalorder %s465_s22, %s461_s20 }
  0x35   : > { %198 = vmatpush.msra.mxu0 %v191_v3  ;;  %p463_p3 = pnand %p462_p1, %p595_p13  ;;  %p468_p7 = por %p467_p8, %p466_p12 }
  0x37   : > { %199 = vmatpush.msra.mxu0 %v190_v4  ;;  %p464_p5 = pneg %p463_p3 }
  0x39   : > { %200 = vmatpush.msra.mxu0 %v189_v5  ;;  %p469_p9 = pnand %p468_p7, %p464_p5 }
  0x3b   : > { %201 = vmatpush.msra.mxu0 %v188_v6 }
  0x3d   : > { %202 = vmatpush.msra.mxu0 %v187_v7 }
  0x3f   : > { %203 = vmatpush.msra.mxu0 %v186_v8 }
  0x41   : > { %204 = vmatpush.msra.mxu0 %v185_v9 }
  0x43   : > { %205 = vmatpush.msra.mxu0 %v184_v10 }
  0x45   : > { %206 = vmatpush.msra.mxu0 %v183_v11 }
  0x47   : > { %207 = vmatpush.msra.mxu0 %v182_v12 }
  0x49   : > { %208 = vmatpush.msra.mxu0 %v181_v13 }
  0x4b   : > { %209 = vmatpush.msra.mxu0 %v180_v14 }
  0x4d   : > { %210 = vmatpush.msra.mxu0 %v179_v15 }
  0x4e   : > { %211 = vmatmul.f32.vlgmr.msra.gmra.mxu0 %v178_v16 }
  0xcb   : > { %v212_v17 = vpop.f32.mrf.mxu0 }
  0xcc   : > { %215 = vst [vmem:[%s177_s13] sm:$0xff] %v212_v17 }
  0xcd   : > { %472 = shalt.err (!%p469_p9)
}
  0xce   : > { %332 = dma.vmem_to_hbm [thread:$0]  (%p595_p13), %s230_s14, 128, %s232_s15, %s217_s18  }
  0xcf PF: > { %s243_s3 = sand.u32 1, %s503_s9   ;;  %p686_p10 = scmp.ge.s32.totalorder %s515_s12, 2 }
  0xd0   : > { %s244_s29 = scalar_lea.sflag [#allocation4], %s243_s3 }
  0xd1   : > { %p343_p11 = pnand %p686_p10, %p600_p4 }
  0xd3   : > { %p344_p0 = pneg %p343_p11 }
  0xd5   : > { %498 = dma.done.wait (%p344_p0), %s244_s29, 128  }
  0xd6   : > { %500 = vsyncadd (%p344_p0), %s244_s29, 4294967168  ;;  %p16_p2 = scmp.ge.s32.totalorder %s575_s23, 4   ;;  %s687_s9 = smov %s507_s10 }
  0xd7   : > { %s688_s10 = smov %s511_s11  ;;  %s689_s11 = smov %s587_s26 }
  0xd8   : > { %s690_s12 = smov %s575_s23  ;;  %18 = sbr.rel (!%p16_p2) target bundleno = 6 (0x6), region = 77 }
  0xdd   :  { %250 = vsyncpa [#allocation3], 1 }
  0xde   :  { %252 = vsyncpa [#allocation3 + $0x1], 1 }
  0xdf   :  { %253 = vsyncpa [#allocation6], 1 }
  0xe0   :  { %254 = vsyncpa [#allocation4], 1 }
  0xe1   :  { %256 = vsyncpa [#allocation4 + $0x1], 1 }

</bundles_post_ra>
